<compile_context>
chip_gen: v7x
topology: tpu7x:2x2x1
jax: 0.10.0
libtpu: 0.0.40
codegen_flags: <defaults>
</compile_context>

<pallas_src>
import functools

import jax
import jax.numpy as jnp
from jax.experimental import pallas as pl
from jax.experimental.pallas import tpu as pltpu


_LANE_TILE = 512      # GEMM / element-wise lane tile (multiple of 256 for v6e/v7x MXU)
_BN_EPS = 1e-5


def _round_up(x, m):
    return (x + m - 1) // m * m


def _compiler_params():
    return pltpu.CompilerParams(
        # Single M grid axis: tiles are independent -> "parallel" (v7x megacore).
        dimension_semantics=("parallel",),
        # Explicit budget; per-step live VMEM is ~2 MiB so this fits every generation
        # (v7x: 64 MiB/TC, v5e/v6e: 128 MiB) with large headroom.
        vmem_limit_bytes=32 * 1024 * 1024,
    )


# ---------------------------------------------------------------------------
# Pallas kernels
# ---------------------------------------------------------------------------

def _conv_gemm_stats_kernel(p_ref, w_ref, b_ref, y_ref, stats_ref, *, m_valid, tm):
    """Fused conv-as-GEMM tile: y = W @ patches + b, plus BN partial statistics.

    p_ref:     (K, tm)         transposed im2col patches for this M tile (streamed)
    w_ref:     (Cout, K)       VMEM-resident weight (index_map -> (0, 0))
    b_ref:     (Cout, 1)       VMEM-resident bias
    y_ref:     (Cout, tm)      lane-dense conv output tile
    stats_ref: (2, Cout, 128)  per-tile partial [sum(y), sum(y*y)] (lane-broadcast)
    """
    m = pl.program_id(0)

    y = jnp.dot(w_ref[...], p_ref[...], preferred_element_type=jnp.float32)
    y = y + b_ref[...]
    y_ref[...] = y

    # --- BatchNorm statistics epilogue (single pass: sum and sum-of-squares),
    # masked to the valid (un-padded) output columns, reduced along the lane axis.
    # Written per-tile (no cross-step accumulation) so the M axis stays "parallel".
    cout = y.shape[0]
    lane = jax.lax.broadcasted_iota(jnp.int32, y.shape, 1)
    valid = lane < (m_valid - m * tm)
    ym = jnp.where(valid, y, 0.0)
    s1 = jnp.sum(ym, axis=1, keepdims=True)          # (Cout, 1)
    s2 = jnp.sum(ym * ym, axis=1, keepdims=True)     # (Cout, 1)
    stats_ref[0, :, :] = jnp.broadcast_to(s1, (cout, 128))
    stats_ref[1, :, :] = jnp.broadcast_to(s2, (cout, 128))


def _bn_relu_kernel(x_ref, s_ref, t_ref, o_ref):
    # o = relu(x * scale + shift)  -- BN affine (precomputed per-channel) + pre-conv ReLU.
    o_ref[...] = jnp.maximum(x_ref[...] * s_ref[...] + t_ref[...], 0.0)


def _bn_add_relu_kernel(skip_ref, y_ref, s_ref, t_ref, o_ref):
    # o = relu(skip + (y * scale + shift))  -- final BN + residual add + ReLU fused.
    o_ref[...] = jnp.maximum(skip_ref[...] + y_ref[...] * s_ref[...] + t_ref[...], 0.0)


# ---------------------------------------------------------------------------
# Pallas wrappers
# ---------------------------------------------------------------------------

def _pad_lanes(a, m_pad):
    m = a.shape[-1]
    if m_pad == m:
        return a
    return jnp.pad(a, ((0, 0), (0, m_pad - m)))


def _conv_gemm_stats(patches, w_t, bias, *, m_valid, tm):
    """patches: (K, M_pad), w_t: (Cout, K), bias: (Cout,) -> (y, sum, sumsq)."""
    K, M_pad = patches.shape
    Cout = w_t.shape[0]
    num_mt = M_pad // tm
    kernel = functools.partial(_conv_gemm_stats_kernel, m_valid=m_valid, tm=tm)
    y, stats = pl.pallas_call(
        kernel,
        grid=(num_mt,),
        in_specs=[
            pl.BlockSpec((K, tm), lambda m: (0, m)),       # patches: streamed over M
            pl.BlockSpec((Cout, K), lambda m: (0, 0)),     # weight:  resident
            pl.BlockSpec((Cout, 1), lambda m: (0, 0)),     # bias:    resident
        ],
        out_specs=[
            pl.BlockSpec((Cout, tm), lambda m: (0, m)),
            pl.BlockSpec((2, Cout, 128), lambda m: (0, 0, m)),
        ],
        out_shape=[
            jax.ShapeDtypeStruct((Cout, M_pad), jnp.float32),
            jax.ShapeDtypeStruct((2, Cout, num_mt * 128), jnp.float32),
        ],
        compiler_params=_compiler_params(),
    )(patches, w_t, bias.reshape(Cout, 1))
    # Tiny glue: collapse per-tile partials -> per-channel (sum, sumsq).
    st = stats.reshape(2, Cout, num_mt, 128)[..., 0].sum(axis=2)
    return y, st[0], st[1]


def _bn_relu(x, scale, shift):
    C, M = x.shape
    tm = min(_LANE_TILE, _round_up(M, 128))
    M_pad = _round_up(M, tm)
    out = pl.pallas_call(
        _bn_relu_kernel,
        grid=(M_pad // tm,),
        in_specs=[
            pl.BlockSpec((C, tm), lambda m: (0, m)),
            pl.BlockSpec((C, 1), lambda m: (0, 0)),
            pl.BlockSpec((C, 1), lambda m: (0, 0)),
        ],
        out_specs=pl.BlockSpec((C, tm), lambda m: (0, m)),
        out_shape=jax.ShapeDtypeStruct((C, M_pad), jnp.float32),
        compiler_params=_compiler_params(),
    )(_pad_lanes(x, M_pad), scale.reshape(C, 1), shift.reshape(C, 1))
    return out[:, :M]


def _bn_add_relu(skip, y, scale, shift):
    C, M = skip.shape
    tm = min(_LANE_TILE, _round_up(M, 128))
    M_pad = _round_up(M, tm)
    out = pl.pallas_call(
        _bn_add_relu_kernel,
        grid=(M_pad // tm,),
        in_specs=[
            pl.BlockSpec((C, tm), lambda m: (0, m)),
            pl.BlockSpec((C, tm), lambda m: (0, m)),
            pl.BlockSpec((C, 1), lambda m: (0, 0)),
            pl.BlockSpec((C, 1), lambda m: (0, 0)),
        ],
        out_specs=pl.BlockSpec((C, tm), lambda m: (0, m)),
        out_shape=jax.ShapeDtypeStruct((C, M_pad), jnp.float32),
        compiler_params=_compiler_params(),
    )(_pad_lanes(skip, M_pad), _pad_lanes(y, M_pad),
      scale.reshape(C, 1), shift.reshape(C, 1))
    return out[:, :M]


# ---------------------------------------------------------------------------
# Plain-JAX glue: transposed im2col + BN scale/shift from fused statistics
# ---------------------------------------------------------------------------

def _im2col_t(x_cf, *, stride):
    """Transposed im2col: (C, N, D, H, W) -> (27*C, M), rows tap-major/channel-minor
    (matches the GEMM weight layout), columns ordered (N, Do, Ho, Wo).
    TODO(synk): replace with an in-kernel implicit-GEMM gather (halo'd DMA windows)
    to eliminate the 27x HBM materialisation of the patch matrix.
    """
    k, pad = 3, 1
    C, N, D, H, W = x_cf.shape
    Do = (D + 2 * pad - k) // stride + 1
    Ho = (H + 2 * pad - k) // stride + 1
    Wo = (W + 2 * pad - k) // stride + 1
    xp = jnp.pad(x_cf, ((0, 0), (0, 0), (pad, pad), (pad, pad), (pad, pad)))
    taps = []
    for kd in range(k):
        for kh in range(k):
            for kw in range(k):
                taps.append(xp[:, :, kd:kd + Do * stride:stride,
                                     kh:kh + Ho * stride:stride,
                                     kw:kw + Wo * stride:stride])
    p = jnp.stack(taps, axis=0)                    # (27, C, N, Do, Ho, Wo)
    M = N * Do * Ho * Wo
    return p.reshape(k * k * k * C, M), (N, Do, Ho, Wo)


def _conv3d(x_cf, w, b, *, stride):
    """3-D conv (k=3, pad=1) + bias + fused BN statistics, channels-first input.
    x_cf: (Cin, N, D, H, W); w: (Cout, Cin, 3, 3, 3); b: (Cout,).
    Returns y (Cout, M), per-channel (sum, sumsq), output dims (N, Do, Ho, Wo).
    """
    Cout = w.shape[0]
    patches, dims = _im2col_t(x_cf, stride=stride)
    K, M = patches.shape
    w_t = jnp.transpose(w, (0, 2, 3, 4, 1)).reshape(Cout, K)

    # Pad K to a sublane multiple of 8 and M to the lane tile.
    K_pad = _round_up(K, 8)
    if K_pad != K:
        patches = jnp.pad(patches, ((0, K_pad - K), (0, 0)))
        w_t = jnp.pad(w_t, ((0, 0), (0, K_pad - K)))
    tm = min(_LANE_TILE, _round_up(M, 128))
    M_pad = _round_up(M, tm)
    patches = _pad_lanes(patches, M_pad)

    y_pad, s1, s2 = _conv_gemm_stats(patches, w_t, b, m_valid=M, tm=tm)
    return y_pad[:, :M], s1, s2, dims


def _bn_scale_shift(sum_x, sum_x2, gamma, beta, count):
    # Training-mode BatchNorm3d (batch statistics, biased variance), collapsed to a
    # per-channel affine y = x*scale + shift.  (C,)-sized glue -> negligible cost.
    mean = sum_x / count
    var = jnp.maximum(sum_x2 / count - mean * mean, 0.0)
    inv = jax.lax.rsqrt(var + _BN_EPS)
    scale = gamma * inv
    shift = beta - mean * scale
    return scale, shift


# ---------------------------------------------------------------------------
# DownTransition parameters + forward
# ---------------------------------------------------------------------------

def init_down_transition_params(key, inchan, layer):
    outchan = 8 if inchan == 1 else 2 * inchan
    params = {}
    keys = jax.random.split(key, 2 + 2 * layer)
    # down conv: Conv3d(inchan -> outchan, k=3, pad=1, stride=2)
    params["down_w"] = 0.1 * jax.random.normal(keys[0], (outchan, inchan, 3, 3, 3), jnp.float32)
    params["down_b"] = 0.1 * jax.random.normal(keys[1], (outchan,), jnp.float32)
    # bn (PyTorch default init: weight=1, bias=0)
    params["bn_g"] = jnp.ones((outchan,), jnp.float32)
    params["bn_b"] = jnp.zeros((outchan,), jnp.float32)
    for i in range(layer):
        params[f"conv{i}_w"] = 0.1 * jax.random.normal(
            keys[2 + 2 * i], (outchan, outchan, 3, 3, 3), jnp.float32)
        params[f"conv{i}_b"] = 0.1 * jax.random.normal(
            keys[3 + 2 * i], (outchan,), jnp.float32)
        params[f"bn{i}_g"] = jnp.ones((outchan,), jnp.float32)
        params[f"bn{i}_b"] = jnp.zeros((outchan,), jnp.float32)
    return params, outchan


@functools.partial(jax.jit, static_argnames=("layer",))
def down_transition_forward(x_ncdhw, params, *, layer):
    # x_ncdhw: (N, Cin, D, H, W)  -- PyTorch layout.
    x_cf = jnp.transpose(x_ncdhw, (1, 0, 2, 3, 4))           # cheap leading-axis swap

    # out1 = self.down(x)          (conv GEMM + bias + BN-statistics epilogue)
    out1, s1, s2, (N, Do, Ho, Wo) = _conv3d(
        x_cf, params["down_w"], params["down_b"], stride=2)
    Cout, M = out1.shape
    scale, shift = _bn_scale_shift(s1, s2, params["bn_g"], params["bn_b"], M)

    # out2 = self.conv(self.bn(out1)),  conv = [ReLU, Conv3d, BN] * layer
    y = out1
    for i in range(layer):
        z = _bn_relu(y, scale, shift)                        # fused BN-apply + pre-conv ReLU
        z_cf = z.reshape(Cout, N, Do, Ho, Wo)
        y, s1, s2, _ = _conv3d(z_cf, params[f"conv{i}_w"], params[f"conv{i}_b"], stride=1)
        scale, shift = _bn_scale_shift(s1, s2, params[f"bn{i}_g"], params[f"bn{i}_b"], M)

    # out2 = self.relu(out1 + out2)     (last BN + residual add + ReLU in one kernel)
    out = _bn_add_relu(out1, y, scale, shift)

    out_cf = out.reshape(Cout, N, Do, Ho, Wo)
    return jnp.transpose(out_cf, (1, 0, 2, 3, 4))            # -> (N, Cout, Do, Ho, Wo)


# ---------------------------------------------------------------------------
# Plain-JAX/XLA reference (same math as the PyTorch module, training-mode BN)
# ---------------------------------------------------------------------------

def _reference_forward(x, params, layer):
    def conv3d(x, w, b, stride):
        y = jax.lax.conv_general_dilated(
            x, w, window_strides=(stride,) * 3, padding=((1, 1),) * 3,
            dimension_numbers=("NCDHW", "OIDHW", "NCDHW"),
            precision=jax.lax.Precision.HIGHEST)
        return y + b.reshape(1, -1, 1, 1, 1)

    def bn(x, g, b):
        mean = jnp.mean(x, axis=(0, 2, 3, 4), keepdims=True)
        var = jnp.mean((x - mean) ** 2, axis=(0, 2, 3, 4), keepdims=True)
        return ((x - mean) * jax.lax.rsqrt(var + _BN_EPS) * g.reshape(1, -1, 1, 1, 1)
                + b.reshape(1, -1, 1, 1, 1))

    out1 = conv3d(x, params["down_w"], params["down_b"], 2)
    y = bn(out1, params["bn_g"], params["bn_b"])
    for i in range(layer):
        y = jnp.maximum(y, 0.0)
        y = conv3d(y, params[f"conv{i}_w"], params[f"conv{i}_b"], 1)
        y = bn(y, params[f"bn{i}_g"], params[f"bn{i}_b"])
    return jnp.maximum(out1 + y, 0.0)


# ---------------------------------------------------------------------------
# Demo
# ---------------------------------------------------------------------------

if __name__ == "__main__":
    key = jax.random.PRNGKey(0)
    k_x, k_p = jax.random.split(key)

    INCHAN, LAYER = 4, 2          # outchan = 8
    N, D, H, W = 2, 8, 8, 8

    x = jax.random.normal(k_x, (N, INCHAN, D, H, W), jnp.float32)
    params, outchan = init_down_transition_params(k_p, INCHAN, LAYER)

    out = down_transition_forward(x, params, layer=LAYER)
    out = jax.block_until_ready(out)

    assert out.shape == (N, outchan, D // 2, H // 2, W // 2), out.shape
    assert out.dtype == jnp.float32
    assert bool(jnp.all(out >= 0.0))          # final ReLU
    assert bool(jnp.all(jnp.isfinite(out)))

    # Numerics self-check against a plain-JAX/XLA reference of the same forward.
    ref = _reference_forward(x, params, LAYER)
    max_err = float(jnp.max(jnp.abs(out - ref)))
    assert max_err < 5e-2, f"mismatch vs reference: max|diff|={max_err}"

    print("KERNEL_OK")
</pallas_src>

<mosaic_0001>
module attributes {stable_mosaic.version = 11 : i64} {
  func.func @_conv_gemm_stats_kernel(%arg0: i32, %arg1: memref<112x128xf32, #tpu.memory_space<vmem>>, %arg2: memref<8x112xf32, #tpu.memory_space<vmem>>, %arg3: memref<8x1xf32, #tpu.memory_space<vmem>>, %arg4: memref<8x128xf32, #tpu.memory_space<vmem>>, %arg5: memref<2x8x128xf32, #tpu.memory_space<vmem>>) attributes {dimension_semantics = [#tpu.dimension_semantics<parallel>], iteration_bounds = array<i64: 1>, scalar_prefetch = 0 : i64, scratch_operands = 0 : i64, tpu.core_type = #tpu.core_type<tc>, window_params = [{transform_indices = @transform_0, window_bounds = array<i64: 112, 128>}, {pipeline_mode = #tpu.pipeline_mode<synchronous>, transform_indices = @transform_1, window_bounds = array<i64: 8, 112>}, {pipeline_mode = #tpu.pipeline_mode<synchronous>, transform_indices = @transform_2, window_bounds = array<i64: 8, 1>}, {transform_indices = @transform_3, window_bounds = array<i64: 8, 128>}, {transform_indices = @transform_4, window_bounds = array<i64: 2, 8, 128>}]} {
    %c0 = arith.constant 0 : index
    %c0_0 = arith.constant 0 : index
    %0 = vector.load %arg2[%c0, %c0_0] : memref<8x112xf32, #tpu.memory_space<vmem>>, vector<8x112xf32>
    %c0_1 = arith.constant 0 : index
    %c0_2 = arith.constant 0 : index
    %1 = vector.load %arg1[%c0_1, %c0_2] : memref<112x128xf32, #tpu.memory_space<vmem>>, vector<112x128xf32>
    %cst = arith.constant dense<0.000000e+00> : vector<8x128xf32>
    %2 = tpu.matmul %0, %1, %cst {dimension_numbers = #tpu.dot_dimension_numbers<[1], [0], [0], [1], [0, 0, 1, 1], [], []>} : vector<8x112xf32>, vector<112x128xf32>, vector<8x128xf32> -> vector<8x128xf32>
    %c0_3 = arith.constant 0 : index
    %c0_4 = arith.constant 0 : index
    %3 = vector.load %arg3[%c0_3, %c0_4] : memref<8x1xf32, #tpu.memory_space<vmem>>, vector<8x1xf32>
    %4 = vector.broadcast %3 : vector<8x1xf32> to vector<8x128xf32>
    %5 = arith.addf %2, %4 : vector<8x128xf32>
    %c0_5 = arith.constant 0 : index
    %c0_6 = arith.constant 0 : index
    %6 = vector.load %arg4[%c0_5, %c0_6] : memref<8x128xf32, #tpu.memory_space<vmem>>, vector<8x128xf32>
    tpu.vector_store %arg4[%c0_5, %c0_6], %5 {strides = array<i32>} : memref<8x128xf32, #tpu.memory_space<vmem>>, vector<8x128xf32>,
    %7 = tpu.iota {dimensions = array<i32: 1>} : vector<8x128xi32>
    %c128_i32 = arith.constant 128 : i32
    %8 = arith.muli %arg0, %c128_i32 : i32
    %c128_i32_7 = arith.constant 128 : i32
    %9 = arith.subi %c128_i32_7, %8 : i32
    %10 = vector.broadcast %9 : i32 to vector<8x128xi32>
    %11 = arith.cmpi slt, %7, %10 : vector<8x128xi32>
    %cst_8 = arith.constant 0.000000e+00 : f32
    %12 = vector.broadcast %cst_8 : f32 to vector<8x128xf32>
    %13 = arith.select %11, %5, %12 : vector<8x128xi1>, vector<8x128xf32>
    %cst_9 = arith.constant dense<0.000000e+00> : vector<8xf32>
    %14 = vector.multi_reduction <add>, %13, %cst_9 [1] : vector<8x128xf32> to vector<8xf32>
    %15 = vector.shape_cast %14 : vector<8xf32> to vector<8x1xf32>
    %16 = arith.mulf %13, %13 : vector<8x128xf32>
    %cst_10 = arith.constant dense<0.000000e+00> : vector<8xf32>
    %17 = vector.multi_reduction <add>, %16, %cst_10 [1] : vector<8x128xf32> to vector<8xf32>
    %18 = vector.shape_cast %17 : vector<8xf32> to vector<8x1xf32>
    %19 = vector.shape_cast %15 : vector<8x1xf32> to vector<8x1xf32>
    %20 = vector.broadcast %19 : vector<8x1xf32> to vector<8x128xf32>
    %c0_11 = arith.constant 0 : index
    %c0_12 = arith.constant 0 : index
    %c0_13 = arith.constant 0 : index
    %21 = vector.load %arg5[%c0_11, %c0_12, %c0_13] : memref<2x8x128xf32, #tpu.memory_space<vmem>>, vector<1x8x128xf32>
    %22 = vector.shape_cast %21 : vector<1x8x128xf32> to vector<8x128xf32>
    %23 = vector.shape_cast %20 : vector<8x128xf32> to vector<1x8x128xf32>
    tpu.vector_store %arg5[%c0_11, %c0_12, %c0_13], %23 {strides = array<i32>} : memref<2x8x128xf32, #tpu.memory_space<vmem>>, vector<1x8x128xf32>,
    %24 = vector.shape_cast %18 : vector<8x1xf32> to vector<8x1xf32>
    %25 = vector.broadcast %24 : vector<8x1xf32> to vector<8x128xf32>
    %c1 = arith.constant 1 : index
    %c0_14 = arith.constant 0 : index
    %c0_15 = arith.constant 0 : index
    %26 = vector.load %arg5[%c1, %c0_14, %c0_15] : memref<2x8x128xf32, #tpu.memory_space<vmem>>, vector<1x8x128xf32>
    %27 = vector.shape_cast %26 : vector<1x8x128xf32> to vector<8x128xf32>
    %28 = vector.shape_cast %25 : vector<8x128xf32> to vector<1x8x128xf32>
    tpu.vector_store %arg5[%c1, %c0_14, %c0_15], %28 {strides = array<i32>} : memref<2x8x128xf32, #tpu.memory_space<vmem>>, vector<1x8x128xf32>,
    return
  }
  func.func @transform_0(%arg0: i32) -> (i32, i32) {
    %c0_i32 = arith.constant 0 : i32
    %c0_i32_0 = arith.constant 0 : i32
    return %c0_i32, %arg0 : i32, i32
  }
  func.func @transform_1(%arg0: i32) -> (i32, i32) {
    %c0_i32 = arith.constant 0 : i32
    %c0_i32_0 = arith.constant 0 : i32
    %c0_i32_1 = arith.constant 0 : i32
    return %c0_i32, %c0_i32_0 : i32, i32
  }
  func.func @transform_2(%arg0: i32) -> (i32, i32) {
    %c0_i32 = arith.constant 0 : i32
    %c0_i32_0 = arith.constant 0 : i32
    %c0_i32_1 = arith.constant 0 : i32
    return %c0_i32, %c0_i32_0 : i32, i32
  }
  func.func @transform_3(%arg0: i32) -> (i32, i32) {
    %c0_i32 = arith.constant 0 : i32
    %c0_i32_0 = arith.constant 0 : i32
    return %c0_i32, %arg0 : i32, i32
  }
  func.func @transform_4(%arg0: i32) -> (i32, i32, i32) {
    %c0_i32 = arith.constant 0 : i32
    %c0_i32_0 = arith.constant 0 : i32
    %c0_i32_1 = arith.constant 0 : i32
    return %c0_i32, %c0_i32_0, %arg0 : i32, i32, i32
  }
}

module attributes {stable_mosaic.version = 11 : i64} {
  func.func @_bn_relu_kernel(%arg0: i32, %arg1: memref<8x128xf32, #tpu.memory_space<vmem>>, %arg2: memref<8x1xf32, #tpu.memory_space<vmem>>, %arg3: memref<8x1xf32, #tpu.memory_space<vmem>>, %arg4: memref<8x128xf32, #tpu.memory_space<vmem>>) attributes {dimension_semantics = [#tpu.dimension_semantics<parallel>], iteration_bounds = array<i64: 1>, scalar_prefetch = 0 : i64, scratch_operands = 0 : i64, tpu.core_type = #tpu.core_type<tc>, window_params = [{transform_indices = @transform_0, window_bounds = array<i64: 8, 128>}, {pipeline_mode = #tpu.pipeline_mode<synchronous>, transform_indices = @transform_1, window_bounds = array<i64: 8, 1>}, {pipeline_mode = #tpu.pipeline_mode<synchronous>, transform_indices = @transform_2, window_bounds = array<i64: 8, 1>}, {transform_indices = @transform_3, window_bounds = array<i64: 8, 128>}]} {
    %c0 = arith.constant 0 : index
    %c0_0 = arith.constant 0 : index
    %0 = vector.load %arg1[%c0, %c0_0] : memref<8x128xf32, #tpu.memory_space<vmem>>, vector<8x128xf32>
    %c0_1 = arith.constant 0 : index
    %c0_2 = arith.constant 0 : index
    %1 = vector.load %arg2[%c0_1, %c0_2] : memref<8x1xf32, #tpu.memory_space<vmem>>, vector<8x1xf32>
    %2 = vector.broadcast %1 : vector<8x1xf32> to vector<8x128xf32>
    %3 = arith.mulf %0, %2 : vector<8x128xf32>
    %c0_3 = arith.constant 0 : index
    %c0_4 = arith.constant 0 : index
    %4 = vector.load %arg3[%c0_3, %c0_4] : memref<8x1xf32, #tpu.memory_space<vmem>>, vector<8x1xf32>
    %5 = vector.broadcast %4 : vector<8x1xf32> to vector<8x128xf32>
    %6 = arith.addf %3, %5 : vector<8x128xf32>
    %cst = arith.constant 0.000000e+00 : f32
    %7 = vector.broadcast %cst : f32 to vector<8x128xf32>
    %8 = arith.maximumf %6, %7 : vector<8x128xf32>
    %c0_5 = arith.constant 0 : index
    %c0_6 = arith.constant 0 : index
    %9 = vector.load %arg4[%c0_5, %c0_6] : memref<8x128xf32, #tpu.memory_space<vmem>>, vector<8x128xf32>
    tpu.vector_store %arg4[%c0_5, %c0_6], %8 {strides = array<i32>} : memref<8x128xf32, #tpu.memory_space<vmem>>, vector<8x128xf32>,
    return
  }
  func.func @transform_0(%arg0: i32) -> (i32, i32) {
    %c0_i32 = arith.constant 0 : i32
    %c0_i32_0 = arith.constant 0 : i32
    return %c0_i32, %arg0 : i32, i32
  }
  func.func @transform_1(%arg0: i32) -> (i32, i32) {
    %c0_i32 = arith.constant 0 : i32
    %c0_i32_0 = arith.constant 0 : i32
    %c0_i32_1 = arith.constant 0 : i32
    return %c0_i32, %c0_i32_0 : i32, i32
  }
  func.func @transform_2(%arg0: i32) -> (i32, i32) {
    %c0_i32 = arith.constant 0 : i32
    %c0_i32_0 = arith.constant 0 : i32
    %c0_i32_1 = arith.constant 0 : i32
    return %c0_i32, %c0_i32_0 : i32, i32
  }
  func.func @transform_3(%arg0: i32) -> (i32, i32) {
    %c0_i32 = arith.constant 0 : i32
    %c0_i32_0 = arith.constant 0 : i32
    return %c0_i32, %arg0 : i32, i32
  }
}

module attributes {stable_mosaic.version = 11 : i64} {
  func.func @_conv_gemm_stats_kernel(%arg0: i32, %arg1: memref<216x128xf32, #tpu.memory_space<vmem>>, %arg2: memref<8x216xf32, #tpu.memory_space<vmem>>, %arg3: memref<8x1xf32, #tpu.memory_space<vmem>>, %arg4: memref<8x128xf32, #tpu.memory_space<vmem>>, %arg5: memref<2x8x128xf32, #tpu.memory_space<vmem>>) attributes {dimension_semantics = [#tpu.dimension_semantics<parallel>], iteration_bounds = array<i64: 1>, scalar_prefetch = 0 : i64, scratch_operands = 0 : i64, tpu.core_type = #tpu.core_type<tc>, window_params = [{transform_indices = @transform_0, window_bounds = array<i64: 216, 128>}, {pipeline_mode = #tpu.pipeline_mode<synchronous>, transform_indices = @transform_1, window_bounds = array<i64: 8, 216>}, {pipeline_mode = #tpu.pipeline_mode<synchronous>, transform_indices = @transform_2, window_bounds = array<i64: 8, 1>}, {transform_indices = @transform_3, window_bounds = array<i64: 8, 128>}, {transform_indices = @transform_4, window_bounds = array<i64: 2, 8, 128>}]} {
    %c0 = arith.constant 0 : index
    %c0_0 = arith.constant 0 : index
    %0 = vector.load %arg2[%c0, %c0_0] : memref<8x216xf32, #tpu.memory_space<vmem>>, vector<8x216xf32>
    %c0_1 = arith.constant 0 : index
    %c0_2 = arith.constant 0 : index
    %1 = vector.load %arg1[%c0_1, %c0_2] : memref<216x128xf32, #tpu.memory_space<vmem>>, vector<216x128xf32>
    %cst = arith.constant dense<0.000000e+00> : vector<8x128xf32>
    %2 = tpu.matmul %0, %1, %cst {dimension_numbers = #tpu.dot_dimension_numbers<[1], [0], [0], [1], [0, 0, 1, 1], [], []>} : vector<8x216xf32>, vector<216x128xf32>, vector<8x128xf32> -> vector<8x128xf32>
    %c0_3 = arith.constant 0 : index
    %c0_4 = arith.constant 0 : index
    %3 = vector.load %arg3[%c0_3, %c0_4] : memref<8x1xf32, #tpu.memory_space<vmem>>, vector<8x1xf32>
    %4 = vector.broadcast %3 : vector<8x1xf32> to vector<8x128xf32>
    %5 = arith.addf %2, %4 : vector<8x128xf32>
    %c0_5 = arith.constant 0 : index
    %c0_6 = arith.constant 0 : index
    %6 = vector.load %arg4[%c0_5, %c0_6] : memref<8x128xf32, #tpu.memory_space<vmem>>, vector<8x128xf32>
    tpu.vector_store %arg4[%c0_5, %c0_6], %5 {strides = array<i32>} : memref<8x128xf32, #tpu.memory_space<vmem>>, vector<8x128xf32>,
    %7 = tpu.iota {dimensions = array<i32: 1>} : vector<8x128xi32>
    %c128_i32 = arith.constant 128 : i32
    %8 = arith.muli %arg0, %c128_i32 : i32
    %c128_i32_7 = arith.constant 128 : i32
    %9 = arith.subi %c128_i32_7, %8 : i32
    %10 = vector.broadcast %9 : i32 to vector<8x128xi32>
    %11 = arith.cmpi slt, %7, %10 : vector<8x128xi32>
    %cst_8 = arith.constant 0.000000e+00 : f32
    %12 = vector.broadcast %cst_8 : f32 to vector<8x128xf32>
    %13 = arith.select %11, %5, %12 : vector<8x128xi1>, vector<8x128xf32>
    %cst_9 = arith.constant dense<0.000000e+00> : vector<8xf32>
    %14 = vector.multi_reduction <add>, %13, %cst_9 [1] : vector<8x128xf32> to vector<8xf32>
    %15 = vector.shape_cast %14 : vector<8xf32> to vector<8x1xf32>
    %16 = arith.mulf %13, %13 : vector<8x128xf32>
    %cst_10 = arith.constant dense<0.000000e+00> : vector<8xf32>
    %17 = vector.multi_reduction <add>, %16, %cst_10 [1] : vector<8x128xf32> to vector<8xf32>
    %18 = vector.shape_cast %17 : vector<8xf32> to vector<8x1xf32>
    %19 = vector.shape_cast %15 : vector<8x1xf32> to vector<8x1xf32>
    %20 = vector.broadcast %19 : vector<8x1xf32> to vector<8x128xf32>
    %c0_11 = arith.constant 0 : index
    %c0_12 = arith.constant 0 : index
    %c0_13 = arith.constant 0 : index
    %21 = vector.load %arg5[%c0_11, %c0_12, %c0_13] : memref<2x8x128xf32, #tpu.memory_space<vmem>>, vector<1x8x128xf32>
    %22 = vector.shape_cast %21 : vector<1x8x128xf32> to vector<8x128xf32>
    %23 = vector.shape_cast %20 : vector<8x128xf32> to vector<1x8x128xf32>
    tpu.vector_store %arg5[%c0_11, %c0_12, %c0_13], %23 {strides = array<i32>} : memref<2x8x128xf32, #tpu.memory_space<vmem>>, vector<1x8x128xf32>,
    %24 = vector.shape_cast %18 : vector<8x1xf32> to vector<8x1xf32>
    %25 = vector.broadcast %24 : vector<8x1xf32> to vector<8x128xf32>
    %c1 = arith.constant 1 : index
    %c0_14 = arith.constant 0 : index
    %c0_15 = arith.constant 0 : index
    %26 = vector.load %arg5[%c1, %c0_14, %c0_15] : memref<2x8x128xf32, #tpu.memory_space<vmem>>, vector<1x8x128xf32>
    %27 = vector.shape_cast %26 : vector<1x8x128xf32> to vector<8x128xf32>
    %28 = vector.shape_cast %25 : vector<8x128xf32> to vector<1x8x128xf32>
    tpu.vector_store %arg5[%c1, %c0_14, %c0_15], %28 {strides = array<i32>} : memref<2x8x128xf32, #tpu.memory_space<vmem>>, vector<1x8x128xf32>,
    return
  }
  func.func @transform_0(%arg0: i32) -> (i32, i32) {
    %c0_i32 = arith.constant 0 : i32
    %c0_i32_0 = arith.constant 0 : i32
    return %c0_i32, %arg0 : i32, i32
  }
  func.func @transform_1(%arg0: i32) -> (i32, i32) {
    %c0_i32 = arith.constant 0 : i32
    %c0_i32_0 = arith.constant 0 : i32
    %c0_i32_1 = arith.constant 0 : i32
    return %c0_i32, %c0_i32_0 : i32, i32
  }
  func.func @transform_2(%arg0: i32) -> (i32, i32) {
    %c0_i32 = arith.constant 0 : i32
    %c0_i32_0 = arith.constant 0 : i32
    %c0_i32_1 = arith.constant 0 : i32
    return %c0_i32, %c0_i32_0 : i32, i32
  }
  func.func @transform_3(%arg0: i32) -> (i32, i32) {
    %c0_i32 = arith.constant 0 : i32
    %c0_i32_0 = arith.constant 0 : i32
    return %c0_i32, %arg0 : i32, i32
  }
  func.func @transform_4(%arg0: i32) -> (i32, i32, i32) {
    %c0_i32 = arith.constant 0 : i32
    %c0_i32_0 = arith.constant 0 : i32
    %c0_i32_1 = arith.constant 0 : i32
    return %c0_i32, %c0_i32_0, %arg0 : i32, i32, i32
  }
}

module attributes {stable_mosaic.version = 11 : i64} {
  func.func @_bn_add_relu_kernel(%arg0: i32, %arg1: memref<8x128xf32, #tpu.memory_space<vmem>>, %arg2: memref<8x128xf32, #tpu.memory_space<vmem>>, %arg3: memref<8x1xf32, #tpu.memory_space<vmem>>, %arg4: memref<8x1xf32, #tpu.memory_space<vmem>>, %arg5: memref<8x128xf32, #tpu.memory_space<vmem>>) attributes {dimension_semantics = [#tpu.dimension_semantics<parallel>], iteration_bounds = array<i64: 1>, scalar_prefetch = 0 : i64, scratch_operands = 0 : i64, tpu.core_type = #tpu.core_type<tc>, window_params = [{transform_indices = @transform_0, window_bounds = array<i64: 8, 128>}, {transform_indices = @transform_1, window_bounds = array<i64: 8, 128>}, {pipeline_mode = #tpu.pipeline_mode<synchronous>, transform_indices = @transform_2, window_bounds = array<i64: 8, 1>}, {pipeline_mode = #tpu.pipeline_mode<synchronous>, transform_indices = @transform_3, window_bounds = array<i64: 8, 1>}, {transform_indices = @transform_4, window_bounds = array<i64: 8, 128>}]} {
    %c0 = arith.constant 0 : index
    %c0_0 = arith.constant 0 : index
    %0 = vector.load %arg1[%c0, %c0_0] : memref<8x128xf32, #tpu.memory_space<vmem>>, vector<8x128xf32>
    %c0_1 = arith.constant 0 : index
    %c0_2 = arith.constant 0 : index
    %1 = vector.load %arg2[%c0_1, %c0_2] : memref<8x128xf32, #tpu.memory_space<vmem>>, vector<8x128xf32>
    %c0_3 = arith.constant 0 : index
    %c0_4 = arith.constant 0 : index
    %2 = vector.load %arg3[%c0_3, %c0_4] : memref<8x1xf32, #tpu.memory_space<vmem>>, vector<8x1xf32>
    %3 = vector.broadcast %2 : vector<8x1xf32> to vector<8x128xf32>
    %4 = arith.mulf %1, %3 : vector<8x128xf32>
    %5 = arith.addf %0, %4 : vector<8x128xf32>
    %c0_5 = arith.constant 0 : index
    %c0_6 = arith.constant 0 : index
    %6 = vector.load %arg4[%c0_5, %c0_6] : memref<8x1xf32, #tpu.memory_space<vmem>>, vector<8x1xf32>
    %7 = vector.broadcast %6 : vector<8x1xf32> to vector<8x128xf32>
    %8 = arith.addf %5, %7 : vector<8x128xf32>
    %cst = arith.constant 0.000000e+00 : f32
    %9 = vector.broadcast %cst : f32 to vector<8x128xf32>
    %10 = arith.maximumf %8, %9 : vector<8x128xf32>
    %c0_7 = arith.constant 0 : index
    %c0_8 = arith.constant 0 : index
    %11 = vector.load %arg5[%c0_7, %c0_8] : memref<8x128xf32, #tpu.memory_space<vmem>>, vector<8x128xf32>
    tpu.vector_store %arg5[%c0_7, %c0_8], %10 {strides = array<i32>} : memref<8x128xf32, #tpu.memory_space<vmem>>, vector<8x128xf32>,
    return
  }
  func.func @transform_0(%arg0: i32) -> (i32, i32) {
    %c0_i32 = arith.constant 0 : i32
    %c0_i32_0 = arith.constant 0 : i32
    return %c0_i32, %arg0 : i32, i32
  }
  func.func @transform_1(%arg0: i32) -> (i32, i32) {
    %c0_i32 = arith.constant 0 : i32
    %c0_i32_0 = arith.constant 0 : i32
    return %c0_i32, %arg0 : i32, i32
  }
  func.func @transform_2(%arg0: i32) -> (i32, i32) {
    %c0_i32 = arith.constant 0 : i32
    %c0_i32_0 = arith.constant 0 : i32
    %c0_i32_1 = arith.constant 0 : i32
    return %c0_i32, %c0_i32_0 : i32, i32
  }
  func.func @transform_3(%arg0: i32) -> (i32, i32) {
    %c0_i32 = arith.constant 0 : i32
    %c0_i32_0 = arith.constant 0 : i32
    %c0_i32_1 = arith.constant 0 : i32
    return %c0_i32, %c0_i32_0 : i32, i32
  }
  func.func @transform_4(%arg0: i32) -> (i32, i32) {
    %c0_i32 = arith.constant 0 : i32
    %c0_i32_0 = arith.constant 0 : i32
    return %c0_i32, %arg0 : i32, i32
  }
}

</mosaic_0001>

<bundles_post_ra>
// kernel: down_transition_forward.7
= control target key start
LH: loop header
LB: loop body
LE: loop exit
PB: predicated region body
PF: predicated region fallthrough
CT: control target
= control target key end

     0   :  { %v37_v0 = vmov 0   ;;  %s70_s1 = inlined_call_operand.vmem [shape: f32[8,1], index: 1, kind: input, shape index: {}]   ;;  %s71_s2 = inlined_call_operand.vmem [shape: f32[8,1], index: 2, kind: input, shape index: {}]   ;;  %s72_s0 = inlined_call_operand.vmem [shape: f32[8,128], index: 0, kind: input, shape index: {}]   ;;  %s73_s3 = inlined_call_operand.vmem [shape: f32[8,128], index: 3, kind: output, shape index: {}]  }
   0x1   :  { %36 = vset.pattern.permute.xlu0 %v37_v0  ;;  %v15_v1 = vld [vmem:[%s70_s1] sm:$0xff] }
   0x2   :  { %18 = vperm.xlu0 %36, %v15_v1   ;;  %v22_v2 = vld [vmem:[%s71_s2] sm:$0xff] }
   0x3   :  { %v14_v4 = vld [vmem:[%s72_s0] sm:$0xff] }
   0x6   :  { %25 = vperm.xlu0 %36, %v22_v2  }
  0x81   :  { %v19_v3 = vpop.permute.xlu0 %18 }
  0x82   :  { %v21_v5 = vmul.f32 %v19_v3, %v14_v4 }
  0x85   :  { %v26_v6 = vpop.permute.xlu0 %25 }
  0x86   :  { %v28_v7 = vadd.f32 %v26_v6, %v21_v5 }
  0x88   :  { %v29_v8 = vmax.f32 %v28_v7, 0.0 }
  0x8a   :  { %30 = vst [vmem:[%s73_s3] sm:$0xff] %v29_v8 }

// kernel: down_transition_forward.6
= control target key start
LH: loop header
LB: loop body
LE: loop exit
PB: predicated region body
PF: predicated region fallthrough
CT: control target
= control target key end

     0   :  { %v209_v0 = vmov 0.0|0.0   ;;  %vm210_vm0 = vmmov 0   ;;  %v211_v4 = vmov 0.0   ;;  %v212_v7 = vmov 0   ;;  %s295_s0 = inlined_call_operand.vmem [shape: f32[112,128], index: 0, kind: input, shape index: {}]   ;;  %s296_s2 = inlined_call_operand.vmem [shape: f32[8,1], index: 2, kind: input, shape index: {}]   ;;  %s297_s1 = inlined_call_operand.vmem [shape: f32[8,112], index: 1, kind: input, shape index: {}]   ;;  %s298_s3 = inlined_call_operand.vmem [shape: f32[8,128], index: 3, kind: output, shape index: {0}]   ;;  %s299_s4 = inlined_call_operand.vmem [shape: f32[2,8,128], index: 4, kind: output, shape index: {1}]  }
   0x1   :  { %183 = vmatprep.subr.bf16.mxu0 %v209_v0  ;;  %v17_v1 = vld [vmem:[%s295_s0] sm:$0xff]  ;;  %v18_v2 = vld [vmem:[%s295_s0 + $0x8] sm:$0xff]  ;;  %v19_v3 = vld [vmem:[%s295_s0 + $0x10] sm:$0xff]  ;;  %180 = vmatprep.mubr.msk.f32.mxu0 %vm210_vm0, %v211_v4  ;;  %vm37_vm1 = vcmask 916480  }
   0x2   :  { %v184_v5 = vpack.c.bf16 %v18_v2, %v17_v1  ;;  %v20_v6 = vld [vmem:[%s295_s0 + $0x18] sm:$0xff]  ;;  %208 = vset.pattern.permute.xlu0 %v212_v7  ;;  %v21_v9 = vld [vmem:[%s295_s0 + $0x20] sm:$0xff]  ;;  %v22_v10 = vld [vmem:[%s295_s0 + $0x28] sm:$0xff] }
   0x3   :  { %v187_v8 = vpack.c.bf16 %v20_v6, %v19_v3  ;;  %v31_v11 = vld [vmem:[%s296_s2] sm:$0xff]  ;;  %v190_v12 = vpack.c.bf16 %v22_v10, %v21_v9  ;;  %v23_v13 = vld [vmem:[%s295_s0 + $0x30] sm:$0xff]  ;;  %v24_v14 = vld [vmem:[%s295_s0 + $0x38] sm:$0xff] }
   0x4   :  { %185 = vmatpush3.bf16.msra.mxu0 %v184_v5  ;;  %34 = vperm.xlu0 %208, %v31_v11   ;;  %v193_v15 = vpack.c.bf16 %v24_v14, %v23_v13  ;;  %v25_v16 = vld [vmem:[%s295_s0 + $0x40] sm:$0xff]  ;;  %v26_v17 = vld [vmem:[%s295_s0 + $0x48] sm:$0xff]  ;;  %v27_v19 = vld [vmem:[%s295_s0 + $0x50] sm:$0xff] }
   0x5   :  { %186 = vmatprep.subr.bf16.mxu0 %v209_v0  ;;  %v196_v18 = vpack.c.bf16 %v26_v17, %v25_v16  ;;  %v28_v20 = vld [vmem:[%s295_s0 + $0x58] sm:$0xff]  ;;  %v29_v22 = vld [vmem:[%s295_s0 + $0x60] sm:$0xff]  ;;  %v30_v23 = vld [vmem:[%s295_s0 + $0x68] sm:$0xff] }
   0x6   :  { %v199_v21 = vpack.c.bf16 %v28_v20, %v27_v19  ;;  %v202_v24 = vpack.c.bf16 %v30_v23, %v29_v22  ;;  %v16_v25 = vld [vmem:[%s297_s1] sm:$0xff] }
   0x8   :  { %188 = vmatpush3.bf16.msra.mxu0 %v187_v8 }
   0x9   :  { %189 = vmatprep.subr.bf16.mxu0 %v209_v0 }
   0xc   :  { %191 = vmatpush3.bf16.msra.mxu0 %v190_v12 }
   0xd   :  { %192 = vmatprep.subr.bf16.mxu0 %v209_v0 }
  0x10   :  { %194 = vmatpush3.bf16.msra.mxu0 %v193_v15 }
  0x11   :  { %195 = vmatprep.subr.bf16.mxu0 %v209_v0 }
  0x14   :  { %197 = vmatpush3.bf16.msra.mxu0 %v196_v18 }
  0x15   :  { %198 = vmatprep.subr.bf16.mxu0 %v209_v0 }
  0x18   :  { %200 = vmatpush3.bf16.msra.mxu0 %v199_v21 }
  0x19   :  { %201 = vmatprep.subr.bf16.mxu0 %v209_v0 }
  0x1c   :  { %203 = vmatpush3.bf16.msra.mxu0 %v202_v24 }
  0x1f   :  { %181 = vmatmul.mubr.msk.f32.vlgmr.msra.gmra.mrb[0].mxu0 %vm37_vm1, %v16_v25 }
  0x83   :  { %v35_v26 = vpop.permute.xlu0 %34 }
  0xf2   :  { %v107_v27 = vpop.f32.mrb[0].mxu0 }
  0xf3   :  { %v108_v28 = vadd.f32 %v107_v27, %v35_v26  ;;  %v182_v29 = vpop.f32.mrb[1].mxu0 }
  0xf5   :  { %111 = vst [vmem:[%s298_s3] sm:$0xff] %v108_v28  ;;  %119 = vadd.xlane.f32.xlu0 %v108_v28  ;;  %v121_v30 = vmul.f32 %v108_v28, %v108_v28 }
  0xf7   :  { %122 = vadd.xlane.f32.xlu1 %v121_v30 }
 0x182   :  { %v120_v31 = vpop.xlane.xlu0 %119 }
 0x183   :  { %124 = vst [vmem:[%s299_s4] sm:$0xff] %v120_v31 }
 0x184   :  { %v123_v32 = vpop.xlane.xlu1 %122 }
 0x185   :  { %136 = vst [vmem:[%s299_s4 + $0x8] sm:$0xff] %v123_v32 }

// kernel: down_transition_forward.8
= control target key start
LH: loop header
LB: loop body
LE: loop exit
PB: predicated region body
PF: predicated region fallthrough
CT: control target
= control target key end

     0   :  { %v194_v0 = vmov 0.0|0.0   ;;  %v195_v4 = vmov 0   ;;  %vm51_vm0 = vcmask 719872   ;;  %v196_v43 = vmov 0.0   ;;  %s334_s0 = inlined_call_operand.vmem [shape: f32[216,128], index: 0, kind: input, shape index: {}]   ;;  %s335_s1 = inlined_call_operand.vmem [shape: f32[8,216], index: 1, kind: input, shape index: {}]   ;;  %s336_s2 = inlined_call_operand.vmem [shape: f32[8,1], index: 2, kind: input, shape index: {}]   ;;  %s337_s3 = inlined_call_operand.vmem [shape: f32[8,128], index: 3, kind: output, shape index: {0}]   ;;  %s338_s4 = inlined_call_operand.vmem [shape: f32[2,8,128], index: 4, kind: output, shape index: {1}]  }
   0x1   :  { %151 = vmatprep.subr.bf16.mxu0 %v194_v0  ;;  %v18_v1 = vld [vmem:[%s334_s0] sm:$0xff]  ;;  %v19_v2 = vld [vmem:[%s334_s0 + $0x8] sm:$0xff]  ;;  %v20_v3 = vld [vmem:[%s334_s0 + $0x10] sm:$0xff]  ;;  %193 = vset.pattern.permute.xlu0 %v195_v4 }
   0x2   :  { %v152_v5 = vpack.c.bf16 %v19_v2, %v18_v1  ;;  %v21_v6 = vld [vmem:[%s334_s0 + $0x18] sm:$0xff]  ;;  %v22_v8 = vld [vmem:[%s334_s0 + $0x20] sm:$0xff]  ;;  %v23_v9 = vld [vmem:[%s334_s0 + $0x28] sm:$0xff] }
   0x3   :  { %v155_v7 = vpack.c.bf16 %v21_v6, %v20_v3  ;;  %v158_v10 = vpack.c.bf16 %v23_v9, %v22_v8  ;;  %v24_v11 = vld [vmem:[%s334_s0 + $0x30] sm:$0xff]  ;;  %v25_v12 = vld [vmem:[%s334_s0 + $0x38] sm:$0xff]  ;;  %v17_v13 = vld [vmem:[%s335_s1 + $0x8] sm:$0xff] }
   0x4   :  { %153 = vmatpush1.bf16.msra.mxu0 %v152_v5  ;;  %v45_v14 = vld [vmem:[%s336_s2] sm:$0xff]  ;;  %149 = vmatprep.mubr.msk.f32.mxu0 %vm51_vm0, %v17_v13  ;;  %v161_v15 = vpack.c.bf16 %v25_v12, %v24_v11  ;;  %v27_v17 = vld [vmem:[%s334_s0 + $0x48] sm:$0xff]  ;;  %v28_v19 = vld [vmem:[%s334_s0 + $0x50] sm:$0xff] }
   0x5   :  { %154 = vmatprep.subr.bf16.mxu0 %v194_v0  ;;  %48 = vperm.xlu0 %193, %v45_v14   ;;  %v26_v16 = vld [vmem:[%s334_s0 + $0x40] sm:$0xff]  ;;  %v29_v20 = vld [vmem:[%s334_s0 + $0x58] sm:$0xff]  ;;  %v31_v23 = vld [vmem:[%s334_s0 + $0x68] sm:$0xff] }
   0x6   :  { %v164_v18 = vpack.c.bf16 %v27_v17, %v26_v16  ;;  %v167_v21 = vpack.c.bf16 %v29_v20, %v28_v19  ;;  %v30_v22 = vld [vmem:[%s334_s0 + $0x60] sm:$0xff]  ;;  %v32_v25 = vld [vmem:[%s334_s0 + $0x70] sm:$0xff]  ;;  %v33_v26 = vld [vmem:[%s334_s0 + $0x78] sm:$0xff] }
   0x7   :  { %v170_v24 = vpack.c.bf16 %v31_v23, %v30_v22  ;;  %v173_v27 = vpack.c.bf16 %v33_v26, %v32_v25  ;;  %v34_v28 = vld [vmem:[%s334_s0 + $0x80] sm:$0xff]  ;;  %v35_v29 = vld [vmem:[%s334_s0 + $0x88] sm:$0xff]  ;;  %v36_v31 = vld [vmem:[%s334_s0 + $0x90] sm:$0xff] }
   0x8   :  { %156 = vmatpush1.bf16.msra.mxu0 %v155_v7  ;;  %v176_v30 = vpack.c.bf16 %v35_v29, %v34_v28  ;;  %v37_v32 = vld [vmem:[%s334_s0 + $0x98] sm:$0xff]  ;;  %v38_v34 = vld [vmem:[%s334_s0 + $0xa0] sm:$0xff]  ;;  %v39_v35 = vld [vmem:[%s334_s0 + $0xa8] sm:$0xff] }
   0x9   :  { %157 = vmatprep.subr.bf16.mxu0 %v194_v0  ;;  %v179_v33 = vpack.c.bf16 %v37_v32, %v36_v31  ;;  %v182_v36 = vpack.c.bf16 %v39_v35, %v38_v34  ;;  %v40_v37 = vld [vmem:[%s334_s0 + $0xb0] sm:$0xff]  ;;  %v41_v38 = vld [vmem:[%s334_s0 + $0xb8] sm:$0xff]  ;;  %v42_v40 = vld [vmem:[%s334_s0 + $0xc0] sm:$0xff] }
   0xa   :  { %v185_v39 = vpack.c.bf16 %v41_v38, %v40_v37  ;;  %v43_v41 = vld [vmem:[%s334_s0 + $0xc8] sm:$0xff]  ;;  %v44_v44 = vld [vmem:[%s334_s0 + $0xd0] sm:$0xff]  ;;  %v16_v45 = vld [vmem:[%s335_s1] sm:$0xff] }
   0xb   :  { %v188_v42 = vpack.c.bf16 %v43_v41, %v42_v40 }
   0xc   :  { %159 = vmatpush1.bf16.msra.mxu0 %v158_v10 }
   0xd   :  { %160 = vmatprep.subr.bf16.mxu0 %v194_v0 }
  0x10   :  { %162 = vmatpush1.bf16.msra.mxu0 %v161_v15 }
  0x11   :  { %163 = vmatprep.subr.bf16.mxu0 %v194_v0 }
  0x14   :  { %165 = vmatpush1.bf16.msra.mxu0 %v164_v18 }
  0x15   :  { %166 = vmatprep.subr.bf16.mxu0 %v194_v0 }
  0x18   :  { %168 = vmatpush1.bf16.msra.mxu0 %v167_v21 }
  0x19   :  { %169 = vmatprep.subr.bf16.mxu0 %v194_v0 }
  0x1c   :  { %171 = vmatpush1.bf16.msra.mxu0 %v170_v24 }
  0x1d   :  { %172 = vmatprep.subr.bf16.mxu0 %v194_v0 }
  0x20   :  { %174 = vmatpush1.bf16.msra.mxu0 %v173_v27 }
  0x21   :  { %175 = vmatprep.subr.bf16.mxu0 %v194_v0 }
  0x24   :  { %177 = vmatpush1.bf16.msra.mxu0 %v176_v30 }
  0x25   :  { %178 = vmatprep.subr.bf16.mxu0 %v194_v0 }
  0x28   :  { %180 = vmatpush1.bf16.msra.mxu0 %v179_v33 }
  0x29   :  { %181 = vmatprep.subr.bf16.mxu0 %v194_v0 }
  0x2c   :  { %183 = vmatpush1.bf16.msra.mxu0 %v182_v36 }
  0x2d   :  { %184 = vmatprep.subr.bf16.mxu0 %v194_v0 }
  0x30   :  { %186 = vmatpush1.bf16.msra.mxu0 %v185_v39 }
  0x31   :  { %187 = vmatprep.subr.bf16.mxu0 %v194_v0 }
  0x34   :  { %189 = vmatpush1.bf16.msra.mxu0 %v188_v42 }
  0x35   :  { %107 = vmatprep.subr.mxu0 %v196_v43 }
  0x38   :  { %108 = vmatpush1.msra.mxu0 %v44_v44 }
  0x39   :  { %120 = vmatmul.mubr.f32.vlgmr.msra.gmra.mrb[0].mxu0 %v16_v45 }
  0x84   :  { %v49_v46 = vpop.permute.xlu0 %48 }
 0x10c   :  { %v121_v47 = vpop.f32.mrb[0].mxu0 }
 0x10d   :  { %v122_v48 = vadd.f32 %v121_v47, %v49_v46  ;;  %v123_v49 = vpop.f32.mrb[1].mxu0 }
 0x10f   :  { %125 = vst [vmem:[%s337_s3] sm:$0xff] %v122_v48  ;;  %133 = vadd.xlane.f32.xlu0 %v122_v48  ;;  %v135_v50 = vmul.f32 %v122_v48, %v122_v48 }
 0x111   :  { %136 = vadd.xlane.f32.xlu1 %v135_v50 }
 0x19c   :  { %v134_v51 = vpop.xlane.xlu0 %133 }
 0x19d   :  { %138 = vst [vmem:[%s338_s4] sm:$0xff] %v134_v51 }
 0x19e   :  { %v137_v52 = vpop.xlane.xlu1 %136 }
 0x19f   :  { %150 = vst [vmem:[%s338_s4 + $0x8] sm:$0xff] %v137_v52 }

// kernel: down_transition_forward.11
= control target key start
LH: loop header
LB: loop body
LE: loop exit
PB: predicated region body
PF: predicated region fallthrough
CT: control target
= control target key end

     0   :  { %v42_v0 = vmov 0   ;;  %s83_s2 = inlined_call_operand.vmem [shape: f32[8,1], index: 2, kind: input, shape index: {}]   ;;  %s84_s3 = inlined_call_operand.vmem [shape: f32[8,1], index: 3, kind: input, shape index: {}]   ;;  %s85_s1 = inlined_call_operand.vmem [shape: f32[8,128], index: 1, kind: input, shape index: {}]   ;;  %s86_s0 = inlined_call_operand.vmem [shape: f32[8,128], index: 0, kind: input, shape index: {}]   ;;  %s87_s4 = inlined_call_operand.vmem [shape: f32[8,128], index: 4, kind: output, shape index: {}]  }
   0x1   :  { %41 = vset.pattern.permute.xlu0 %v42_v0  ;;  %v19_v1 = vld [vmem:[%s83_s2] sm:$0xff] }
   0x2   :  { %22 = vperm.xlu0 %41, %v19_v1   ;;  %v27_v2 = vld [vmem:[%s84_s3] sm:$0xff] }
   0x3   :  { %v18_v3 = vld [vmem:[%s85_s1] sm:$0xff] }
   0x4   :  { %v17_v5 = vld [vmem:[%s86_s0] sm:$0xff] }
   0x6   :  { %30 = vperm.xlu0 %41, %v27_v2  }
  0x81   :  { %v23_v4 = vpop.permute.xlu0 %22 }
  0x82   :  { %v25_v6 = vmul.f32 %v23_v4, %v18_v3 }
  0x84   :  { %v26_v7 = vadd.f32 %v25_v6, %v17_v5 }
  0x85   :  { %v31_v8 = vpop.permute.xlu0 %30 }
  0x86   :  { %v33_v9 = vadd.f32 %v31_v8, %v26_v7 }
  0x88   :  { %v34_v10 = vmax.f32 %v33_v9, 0.0 }
  0x8a   :  { %35 = vst [vmem:[%s87_s4] sm:$0xff] %v34_v10 }

</bundles_post_ra>
